<compile_context>
chip_gen: v7x
topology: tpu7x:2x2x1
jax: 0.10.0
libtpu: 0.0.40
codegen_flags: <defaults>
</compile_context>

<pallas_src>
import functools

import jax
import jax.numpy as jnp
from jax.experimental import pallas as pl
from jax.experimental.pallas import tpu as pltpu


def _leaky_relu(x, slope=0.2):
    # max(x, slope*x): one mul + one max on the VPU (slope < 1).
    return jnp.maximum(x, slope * x)


def _round_up(x, m):
    return (x + m - 1) // m * m


# ---------------------------------------------------------------------------
# Pass 1: per-tile partial sums / sums-of-squares of h2 (for BatchNorm stats)
# ---------------------------------------------------------------------------
def _stats_kernel(x_ref, w1_ref, b1_ref, w2_ref, part_ref, *,
                  tile_hw, hw_total, needs_mask):
    # x_ref: (1, Cin, tile_hw) f32 — channels in sublanes, pixels in lanes.
    x = x_ref[0].astype(jnp.bfloat16)
    # TODO(synk): conv1 has K=Cin (3-6) -> tiny MXU utilization; a VPU broadcast-FMA
    # variant may win here — verify with a bundle dump before switching.
    h1 = jnp.dot(w1_ref[...], x, preferred_element_type=jnp.float32) + b1_ref[...]
    h1 = _leaky_relu(h1)
    h2 = jnp.dot(w2_ref[...], h1.astype(jnp.bfloat16),
                 preferred_element_type=jnp.float32)            # (C2, tile_hw) f32
    if needs_mask:
        # Padded pixels (lane index >= hw_total) must not contribute to batch stats.
        base = pl.program_id(1) * tile_hw
        cols = base + jax.lax.broadcasted_iota(jnp.int32, (1, tile_hw), 1)
        h2 = jnp.where(cols < hw_total, h2, 0.0)
    s = jnp.sum(h2, axis=1, keepdims=True)         # (C2, 1)
    ss = jnp.sum(h2 * h2, axis=1, keepdims=True)   # (C2, 1)
    part_ref[...] = jnp.concatenate([s, ss], axis=1)[None, None]   # (1, 1, C2, 2)


# ---------------------------------------------------------------------------
# Pass 2: fused conv1 + lrelu + conv2 + BN-affine + lrelu + conv3
# ---------------------------------------------------------------------------
def _fwd_kernel(x_ref, w1_ref, b1_ref, w2_ref, scale_ref, shift_ref, w3_ref, o_ref):
    x = x_ref[0].astype(jnp.bfloat16)
    h1 = jnp.dot(w1_ref[...], x, preferred_element_type=jnp.float32) + b1_ref[...]
    h1 = _leaky_relu(h1)
    h2 = jnp.dot(w2_ref[...], h1.astype(jnp.bfloat16),
                 preferred_element_type=jnp.float32)
    h2 = _leaky_relu(h2 * scale_ref[...] + shift_ref[...])       # f32 BN affine
    out = jnp.dot(w3_ref[...], h2.astype(jnp.bfloat16),
                  preferred_element_type=jnp.float32)            # (1, tile_hw)
    o_ref[...] = out[None].astype(o_ref.dtype)                   # lane-dense store


def pixel_discriminator(x_nchw, params, *, tile_hw_max=8192, eps=1e-5):
    """x_nchw: (N, Cin, H, W) float32. Returns (N, 1, H, W)."""
    w1, b1, w2, gamma, beta, w3 = params
    N, Cin, H, W = x_nchw.shape
    ndf = w1.shape[0]
    C2 = w2.shape[0]
    HW = H * W
    M = N * HW  # real pixel count (for BatchNorm statistics)

    # Pixels in the lane dim: tile HW in multiples of 128 lanes.
    tile_hw = min(tile_hw_max, _round_up(HW, 128))
    # v7x megacore: keep >= 2 grid steps on the parallel axes when possible.
    if N * (_round_up(HW, tile_hw) // tile_hw) < 2 and tile_hw > 128:
        tile_hw = _round_up(tile_hw // 2, 128)
    HW_pad = _round_up(HW, tile_hw)
    T = HW_pad // tile_hw
    needs_mask = HW_pad != HW

    # Native NCHW layout -> (N, Cin, HW); no NCHW->NHWC HBM round trip.
    x3 = x_nchw.reshape(N, Cin, HW)
    if needs_mask:
        x3 = jnp.pad(x3, ((0, 0), (0, 0), (0, HW_pad - HW)))

    # bf16 MXU operands; bias / BN affine stay f32.
    w1b = w1.astype(jnp.bfloat16)                     # (ndf, Cin)
    w2b = w2.astype(jnp.bfloat16)                     # (C2, ndf)
    w3b = w3.astype(jnp.bfloat16)                     # (1, C2)
    b1c = b1.reshape(ndf, 1).astype(jnp.float32)      # (ndf, 1)

    cparams = pltpu.CompilerParams(
        dimension_semantics=("parallel", "parallel"),
        vmem_limit_bytes=48 * 1024 * 1024,
    )

    # ---- Pass 1: BatchNorm batch statistics (per-tile partials) -------------
    partials = pl.pallas_call(
        functools.partial(_stats_kernel, tile_hw=tile_hw, hw_total=HW,
                          needs_mask=needs_mask),
        out_shape=jax.ShapeDtypeStruct((N, T, C2, 2), jnp.float32),
        grid=(N, T),
        in_specs=[
            pl.BlockSpec((1, Cin, tile_hw), lambda n, j: (n, 0, j)),
            pl.BlockSpec((ndf, Cin), lambda n, j: (0, 0)),
            pl.BlockSpec((ndf, 1), lambda n, j: (0, 0)),
            pl.BlockSpec((C2, ndf), lambda n, j: (0, 0)),
        ],
        out_specs=pl.BlockSpec((1, 1, C2, 2), lambda n, j: (n, j, 0, 0)),
        compiler_params=cparams,
        cost_estimate=pl.CostEstimate(
            flops=2 * N * HW_pad * (Cin * ndf + ndf * C2),
            transcendentals=0,
            bytes_accessed=(N * HW_pad * Cin * 4
                            + 2 * (Cin * ndf + ndf + ndf * C2)
                            + N * T * C2 * 2 * 4)),
    )(x3, w1b, b1c, w2b)

    # Reduce partials and fold BatchNorm into a single per-channel affine.
    totals = jnp.sum(partials, axis=(0, 1))               # (C2, 2)
    mean = totals[:, 0] / M
    # TODO(synk): E[x^2]-E[x]^2 can cancel if |mean| >> std; a centered second moment
    # (via the v7x h2-stash variant) would be the fix if that ever matters.
    var = jnp.maximum(totals[:, 1] / M - mean * mean, 0.0)  # biased batch variance
    scale = gamma.reshape(-1) * jax.lax.rsqrt(var + eps)     # (C2,)
    shift = beta.reshape(-1) - mean * scale                  # (C2,)
    scale = scale.reshape(C2, 1)
    shift = shift.reshape(C2, 1)

    # ---- Pass 2: normalize + conv3 (fully parallel over pixel tiles) --------
    out3 = pl.pallas_call(
        _fwd_kernel,
        out_shape=jax.ShapeDtypeStruct((N, 1, HW_pad), jnp.float32),
        grid=(N, T),
        in_specs=[
            pl.BlockSpec((1, Cin, tile_hw), lambda n, j: (n, 0, j)),
            pl.BlockSpec((ndf, Cin), lambda n, j: (0, 0)),
            pl.BlockSpec((ndf, 1), lambda n, j: (0, 0)),
            pl.BlockSpec((C2, ndf), lambda n, j: (0, 0)),
            pl.BlockSpec((C2, 1), lambda n, j: (0, 0)),
            pl.BlockSpec((C2, 1), lambda n, j: (0, 0)),
            pl.BlockSpec((1, C2), lambda n, j: (0, 0)),
        ],
        out_specs=pl.BlockSpec((1, 1, tile_hw), lambda n, j: (n, 0, j)),
        compiler_params=cparams,
        cost_estimate=pl.CostEstimate(
            flops=2 * N * HW_pad * (Cin * ndf + ndf * C2 + C2),
            transcendentals=0,
            bytes_accessed=N * HW_pad * Cin * 4 + N * HW_pad * 4),
    )(x3, w1b, b1c, w2b, scale, shift, w3b)

    if needs_mask:
        out3 = out3[:, :, :HW]
    return out3.reshape(N, 1, H, W)


def init_params(key, input_nc, ndf):
    """Deterministic parameter init (shapes match the PyTorch module, output-major)."""
    k1, k2, k3, k4 = jax.random.split(key, 4)
    # Conv weights stored as (Cout, Cin) matmul matrices (PyTorch: (Cout, Cin, 1, 1)).
    w1 = 0.02 * jax.random.normal(k1, (ndf, input_nc), jnp.float32)
    b1 = 0.01 * jax.random.normal(k2, (ndf,), jnp.float32)
    w2 = 0.02 * jax.random.normal(k3, (2 * ndf, ndf), jnp.float32)
    gamma = jnp.ones((2 * ndf,), jnp.float32)   # BatchNorm affine weight
    beta = jnp.zeros((2 * ndf,), jnp.float32)   # BatchNorm affine bias
    w3 = 0.02 * jax.random.normal(k4, (1, 2 * ndf), jnp.float32)
    return (w1, b1, w2, gamma, beta, w3)


def reference_forward(x_nchw, params, eps=1e-5):
    """Pure-JAX f32 reference matching PyTorch semantics (for verification)."""
    w1, b1, w2, gamma, beta, w3 = params
    N, Cin, H, W = x_nchw.shape
    x = x_nchw.reshape(N, Cin, H * W)
    h1 = jnp.einsum('oc,ncp->nop', w1, x) + b1.reshape(1, -1, 1)
    h1 = jnp.where(h1 > 0, h1, 0.2 * h1)
    h2 = jnp.einsum('oc,ncp->nop', w2, h1)
    mean = jnp.mean(h2, axis=(0, 2), keepdims=True)
    var = jnp.mean((h2 - mean) ** 2, axis=(0, 2), keepdims=True)
    h2n = (h2 - mean) / jnp.sqrt(var + eps) * gamma.reshape(1, -1, 1) \
        + beta.reshape(1, -1, 1)
    h2n = jnp.where(h2n > 0, h2n, 0.2 * h2n)
    out = jnp.einsum('oc,ncp->nop', w3, h2n)
    return out.reshape(N, 1, H, W)


if __name__ == "__main__":
    key = jax.random.PRNGKey(0)
    kx, kp = jax.random.split(key)

    # Small shapes: batch=2, input_nc=4, H=W=16, ndf=8
    N, input_nc, H, W = 2, 4, 16, 16
    ndf = 8

    x = jax.random.normal(kx, (N, input_nc, H, W), jnp.float32)
    params = init_params(kp, input_nc, ndf)

    out = pixel_discriminator(x, params)
    out = jax.block_until_ready(out)

    ref = reference_forward(x, params)
    assert out.shape == (N, 1, H, W), out.shape
    # bf16 matmul operands (f32 accumulation) -> looser tolerance vs the f32 reference.
    err = float(jnp.max(jnp.abs(out - ref)))
    assert err < 2e-2, f"mismatch vs reference: max abs err {err}"

    print("KERNEL_OK")
</pallas_src>

<mosaic_0001>
module attributes {stable_mosaic.version = 11 : i64} {
  func.func @_stats_kernel(%arg0: i32, %arg1: i32, %arg2: memref<1x4x256xf32, #tpu.memory_space<vmem>>, %arg3: memref<8x4xbf16, #tpu.memory_space<vmem>>, %arg4: memref<8x1xf32, #tpu.memory_space<vmem>>, %arg5: memref<16x8xbf16, #tpu.memory_space<vmem>>, %arg6: memref<1x1x16x2xf32, #tpu.memory_space<vmem>>) attributes {dimension_semantics = [#tpu.dimension_semantics<parallel>, #tpu.dimension_semantics<parallel>], iteration_bounds = array<i64: 2, 1>, scalar_prefetch = 0 : i64, scratch_operands = 0 : i64, tpu.core_type = #tpu.core_type<tc>, window_params = [{transform_indices = @transform_0, window_bounds = array<i64: 1, 4, 256>}, {pipeline_mode = #tpu.pipeline_mode<synchronous>, transform_indices = @transform_1, window_bounds = array<i64: 8, 4>}, {pipeline_mode = #tpu.pipeline_mode<synchronous>, transform_indices = @transform_2, window_bounds = array<i64: 8, 1>}, {pipeline_mode = #tpu.pipeline_mode<synchronous>, transform_indices = @transform_3, window_bounds = array<i64: 16, 8>}, {transform_indices = @transform_4, window_bounds = array<i64: 1, 1, 16, 2>}]} {
    %c0 = arith.constant 0 : index
    %c0_0 = arith.constant 0 : index
    %c0_1 = arith.constant 0 : index
    %0 = vector.load %arg2[%c0, %c0_0, %c0_1] : memref<1x4x256xf32, #tpu.memory_space<vmem>>, vector<1x4x256xf32>
    %1 = vector.shape_cast %0 : vector<1x4x256xf32> to vector<4x256xf32>
    %2 = arith.truncf %1 : vector<4x256xf32> to vector<4x256xbf16>
    %c0_2 = arith.constant 0 : index
    %c0_3 = arith.constant 0 : index
    %3 = vector.load %arg3[%c0_2, %c0_3] : memref<8x4xbf16, #tpu.memory_space<vmem>>, vector<8x4xbf16>
    %cst = arith.constant dense<0.000000e+00> : vector<8x256xf32>
    %4 = tpu.matmul %3, %2, %cst {dimension_numbers = #tpu.dot_dimension_numbers<[1], [0], [0], [1], [0, 0, 1, 1], [], []>} : vector<8x4xbf16>, vector<4x256xbf16>, vector<8x256xf32> -> vector<8x256xf32>
    %c0_4 = arith.constant 0 : index
    %c0_5 = arith.constant 0 : index
    %5 = vector.load %arg4[%c0_4, %c0_5] : memref<8x1xf32, #tpu.memory_space<vmem>>, vector<8x1xf32>
    %6 = vector.broadcast %5 : vector<8x1xf32> to vector<8x256xf32>
    %7 = arith.addf %4, %6 : vector<8x256xf32>
    %cst_6 = arith.constant 2.000000e-01 : f32
    %8 = vector.broadcast %cst_6 : f32 to vector<8x256xf32>
    %9 = arith.mulf %8, %7 : vector<8x256xf32>
    %10 = arith.maximumf %7, %9 : vector<8x256xf32>
    %c0_7 = arith.constant 0 : index
    %c0_8 = arith.constant 0 : index
    %11 = vector.load %arg5[%c0_7, %c0_8] : memref<16x8xbf16, #tpu.memory_space<vmem>>, vector<16x8xbf16>
    %12 = arith.truncf %10 : vector<8x256xf32> to vector<8x256xbf16>
    %cst_9 = arith.constant dense<0.000000e+00> : vector<16x256xf32>
    %13 = tpu.matmul %11, %12, %cst_9 {dimension_numbers = #tpu.dot_dimension_numbers<[1], [0], [0], [1], [0, 0, 1, 1], [], []>} : vector<16x8xbf16>, vector<8x256xbf16>, vector<16x256xf32> -> vector<16x256xf32>
    %cst_10 = arith.constant dense<0.000000e+00> : vector<16xf32>
    %14 = vector.multi_reduction <add>, %13, %cst_10 [1] : vector<16x256xf32> to vector<16xf32>
    %15 = vector.shape_cast %14 : vector<16xf32> to vector<16x1xf32>
    %16 = arith.mulf %13, %13 : vector<16x256xf32>
    %cst_11 = arith.constant dense<0.000000e+00> : vector<16xf32>
    %17 = vector.multi_reduction <add>, %16, %cst_11 [1] : vector<16x256xf32> to vector<16xf32>
    %18 = vector.shape_cast %17 : vector<16xf32> to vector<16x1xf32>
    %19 = tpu.concatenate %15, %18 in 1 : vector<16x1xf32>, vector<16x1xf32> -> vector<16x2xf32>
    %20 = vector.shape_cast %19 : vector<16x2xf32> to vector<1x1x16x2xf32>
    %c0_12 = arith.constant 0 : index
    %c0_13 = arith.constant 0 : index
    %c0_14 = arith.constant 0 : index
    %c0_15 = arith.constant 0 : index
    %21 = vector.load %arg6[%c0_12, %c0_13, %c0_14, %c0_15] : memref<1x1x16x2xf32, #tpu.memory_space<vmem>>, vector<1x1x16x2xf32>
    tpu.vector_store %arg6[%c0_12, %c0_13, %c0_14, %c0_15], %20 {strides = array<i32>} : memref<1x1x16x2xf32, #tpu.memory_space<vmem>>, vector<1x1x16x2xf32>,
    return
  }
  func.func @transform_0(%arg0: i32, %arg1: i32) -> (i32, i32, i32) {
    %c0_i32 = arith.constant 0 : i32
    %c0_i32_0 = arith.constant 0 : i32
    return %arg0, %c0_i32, %arg1 : i32, i32, i32
  }
  func.func @transform_1(%arg0: i32, %arg1: i32) -> (i32, i32) {
    %c0_i32 = arith.constant 0 : i32
    %c0_i32_0 = arith.constant 0 : i32
    %c0_i32_1 = arith.constant 0 : i32
    return %c0_i32, %c0_i32_0 : i32, i32
  }
  func.func @transform_2(%arg0: i32, %arg1: i32) -> (i32, i32) {
    %c0_i32 = arith.constant 0 : i32
    %c0_i32_0 = arith.constant 0 : i32
    %c0_i32_1 = arith.constant 0 : i32
    return %c0_i32, %c0_i32_0 : i32, i32
  }
  func.func @transform_3(%arg0: i32, %arg1: i32) -> (i32, i32) {
    %c0_i32 = arith.constant 0 : i32
    %c0_i32_0 = arith.constant 0 : i32
    %c0_i32_1 = arith.constant 0 : i32
    return %c0_i32, %c0_i32_0 : i32, i32
  }
  func.func @transform_4(%arg0: i32, %arg1: i32) -> (i32, i32, i32, i32) {
    %c0_i32 = arith.constant 0 : i32
    %c0_i32_0 = arith.constant 0 : i32
    %c0_i32_1 = arith.constant 0 : i32
    return %arg0, %arg1, %c0_i32, %c0_i32_0 : i32, i32, i32, i32
  }
}

</mosaic_0001>

<bundles_post_ra>
// kernel: tpu_custom_call.1
= control target key start
LH: loop header
LB: loop body
LE: loop exit
PB: predicated region body
PF: predicated region fallthrough
CT: control target
= control target key end

     0   :  { %s576_s15 = smov 0   ;;  %s578_s16 = smov 0   ;;  %s622_s0 = inlined_call_operand.vmem [shape: f32[2,4,256], index: 0, kind: input, shape index: {}]   ;;  %s623_s1 = inlined_call_operand.vmem [shape: bf16[8,4], index: 1, kind: input, shape index: {}]   ;;  %s624_s2 = inlined_call_operand.vmem [shape: f32[8,1], index: 2, kind: input, shape index: {}]   ;;  %s625_s3 = inlined_call_operand.vmem [shape: bf16[16,8], index: 3, kind: input, shape index: {}]   ;;  %s626_s4 = inlined_call_operand.vmem [shape: f32[2,1,16,2], index: 4, kind: output, shape index: {}]  }
   0x1   :  { %s580_s17 = smov 0  }
   0x2 LB: > { %s26_s18 = sadd.s32 1, %s544_s16  ;;  %p484_p0 = scmp.ge.s32.totalorder %s548_s17, 1  ;;  %s548_s17 = sphi %s580_s17, %s14_s17   ;;  %s544_s16 = sphi %s578_s16, %s628_s16   ;;  %s540_s15 = sphi %s576_s15, %s627_s15  }
   0x3   : > { %p28_p1 = scmp.ge.s32.totalorder %s26_s18, 2  ;;  %p183_p2 = scmp.lt.s32.totalorder %s548_s17, 3 }
   0x5   : > { %s630_s18 = smov (%p28_p1, %s26_s18), 0  ;;  %p184_p3 = pnand %p484_p0, %p183_p2 }
   0x6   : > { %p218_p4 = scmp.lt.s32.totalorder (!%p184_p3), %s540_s15, 1  ;;  %v550_v0 = vmov (!%p184_p3), 0   ;;  %v244_v1 = vld [vmem:[%s624_s2] sm:$0xff] (!%p184_p3)  ;;  %vm254_vm0 = vcmask (!%p184_p3), 1041408   ;;  %vm250_vm1 = vcmask (!%p184_p3), 31744   ;;  %vm319_vm2 = vcmask (!%p184_p3), 1043456  }
   0x7   : > { %187 = sbr.rel (%p184_p3) target bundleno = 620 (0x26c), region = 36  ;;  %293 = vmatprep.mubr.bf16.mxu0 (!%p184_p3), %v550_v0  ;;  %523 = vset.pattern.permute.xlu0 (!%p184_p3), %v550_v0  ;;  %v243_v7 = vld [vmem:[%s623_s1] sm:$0xf] (!%p184_p3)  ;;  %vm315_vm3 = vcmask (!%p184_p3), 64512   ;;  %vm385_vm4 = vcmask (!%p184_p3), 7168   ;;  %vm388_vm5 = vcmask (!%p184_p3), 15360  }
   0x8   : > { %247 = vperm.xlu0 (!%p184_p3), %523, %v244_v1   ;;  %358 = vmatprep.mubr.bf16.mxu1 (!%p184_p3), %v550_v0  ;;  %v525_v22 = vld [vmem:[%s625_s3] sm:$0xff] (!%p184_p3)  }
   0xe   : > { %s632_s15 = smov (!%p218_p4, %s540_s15), 1 }
   0xf   : > { %s496_s21 = sshll.u32 %s632_s15, 3  ;;  %s497_s29 = sshll.u32 %s632_s15, 4 }
  0x10   : > { %s225_s24 = scalar_lea.vmem %s622_s0, %s496_s21  ;;  %s235_s6 = scalar_lea.vmem %s626_s4, %s497_s29 }
  0x11   : > { %v237_v2 = vld [vmem:[%s225_s24] sm:$0xff] }
  0x12   : > { %v239_v3 = vcombine.high %v237_v2, %v237_v2  ;;  %v241_v4 = vpack.c.bf16 %v237_v2, %v237_v2 }
  0x14   : > { %v242_v5 = vpack.c.bf16 %v239_v3, %v239_v3  ;;  %v256_v6 = vsel %vm254_vm0, %v241_v4, 0 }
  0x16   : > { %489 = vmatprep.subr.msk.bf16.mxu0 %vm254_vm0, %v242_v5 }
  0x17   : > { %262 = vmatpush1.bf16.msra.mxu0 %v256_v6 }
  0x1a   : > { %490 = vmatmul.mubr.msk.bf16.vlgmr.msra.gmra.mrb[0].mxu0 %vm250_vm1, %v243_v7 }
  0x87   : > { %v248_v8 = vpop.permute.xlu0 %247 }
  0xed   : > { %v295_v9 = vpop.f32.mrb[0].mxu0 }
  0xee   : > { %v296_v10 = vadd.f32 %v295_v9, %v248_v8  ;;  %v297_v11 = vpop.f32.mrb[1].mxu0 }
  0xef   : > { %v298_v12 = vadd.f32 %v297_v11, %v248_v8  ;;  %v299_v13 = vpop.f32.mrb[2].mxu0 }
  0xf0   : > { %v302_v14 = vmul.f32 0.2, %v296_v10  ;;  %v300_v15 = vpop.f32.mrb[3].mxu0 }
  0xf1   : > { %v303_v16 = vmul.f32 0.2, %v298_v12 }
  0xf2   : > { %v304_v17 = vmax.f32 %v296_v10, %v302_v14 }
  0xf3   : > { %v305_v18 = vmax.f32 %v298_v12, %v303_v16 }
  0xf4   : > { %v308_v19 = vpack.c.bf16 %v304_v17, %v304_v17 }
  0xf5   : > { %v309_v20 = vpack.c.bf16 %v305_v18, %v305_v18 }
  0xf6   : > { %v321_v21 = vsel %vm319_vm2, %v308_v19, 0 }
  0xf7   : > { %492 = vmatprep.subr.msk.bf16.mxu1 %vm319_vm2, %v309_v20 }
  0xf8   : > { %327 = vmatpush1.bf16.msra.mxu1 %v321_v21 }
  0xfb   : > { %493 = vmatmul.mubr.msk.bf16.vlgmr.msra.gmra.mrb[0].mxu1 %vm315_vm3, %v525_v22 }
 0x1ce   : > { %v360_v23 = vpop.f32.mrb[0].mxu1 }
 0x1cf   : > { %v375_v24 = vmul.f32 %v360_v23, %v360_v23  ;;  %v362_v25 = vpop.f32.mrb[1].mxu1 }
 0x1d0   : > { %v376_v26 = vmul.f32 %v362_v25, %v362_v25  ;;  %v364_v27 = vpop.f32.mrb[2].mxu1  ;;  %v369_v28 = vadd.f32 %v362_v25, %v360_v23 }
 0x1d1   : > { %v377_v29 = vmul.f32 %v364_v27, %v364_v27  ;;  %v366_v30 = vpop.f32.mrb[3].mxu1 }
 0x1d2   : > { %v378_v31 = vmul.f32 %v366_v30, %v366_v30  ;;  %370 = vadd.xlane.f32.xlu0 %v369_v28  ;;  %v372_v32 = vadd.f32 %v366_v30, %v364_v27  ;;  %v379_v33 = vadd.f32 %v376_v26, %v375_v24 }
 0x1d4   : > { %373 = vadd.xlane.f32.xlu1 %v372_v32  ;;  %v382_v34 = vadd.f32 %v378_v31, %v377_v29 }
 0x1d8   : > { %380 = vadd.xlane.f32.xlu1 %v379_v33 }
 0x1dc   : > { %383 = vadd.xlane.f32.xlu1 %v382_v34 }
 0x25f   : > { %v371_v36 = vpop.xlane.xlu0 %370 }
 0x261   : > { %v374_v35 = vpop.xlane.xlu1 %373 }
 0x265   : > { %v381_v37 = vpop.xlane.xlu1 %380 }
 0x266   : > { %v386_v38 = vsel %vm385_vm4, %v371_v36, %v381_v37 }
 0x267   : > { %389 = vst.msk [vmem:[%s235_s6] sm:$0xff] %vm388_vm5, %v386_v38 }
 0x269   : > { %v384_v39 = vpop.xlane.xlu1 %383 }
 0x26a   : > { %v387_v40 = vsel %vm385_vm4, %v374_v35, %v384_v39 }
 0x26b   : > { %390 = vst.msk [vmem:[%s235_s6 + $0x8] sm:$0xff] %vm388_vm5, %v387_v40 }
 0x26c PF: > { %s14_s17 = sadd.s32 1, %s548_s17   ;;  %s627_s15 = smov %s544_s16 }
 0x26d   : > { %p11_p5 = scmp.ge.s32.totalorder %s14_s17, 4   ;;  %s628_s16 = smov %s630_s18 }
 0x26f   :  { %13 = sbr.rel (!%p11_p5) target bundleno = 2 (0x2), region = 66 }

</bundles_post_ra>
